<compile_context>
chip_gen: v7x
topology: tpu7x:2x2x1
jax: 0.10.0
libtpu: 0.0.40
codegen_flags: <defaults>
</compile_context>

<pallas_src>
import numpy as np
import jax
import jax.numpy as jnp
from jax import lax
from jax.experimental import pallas as pl
from jax.experimental.pallas import tpu as pltpu


# --------------------------------------------------------------------------- #
# Emission projection: one big, MXU-shaped matmul  (T*B, H) @ (H, NT) + bias.  #
# --------------------------------------------------------------------------- #
def _emission_kernel(h_ref,      # VMEM (tm, H)  f32
                     w_ref,      # VMEM (H, NT)  f32  (Linear weight, transposed)
                     b_ref,      # VMEM (1, NT)  f32
                     out_ref):   # OUT  (tm, NT) f32
    out_ref[...] = (jnp.dot(h_ref[...], w_ref[...],
                            preferred_element_type=jnp.float32) + b_ref[...])


def _project_emissions(hidden_tbh, weight, bias):
    """emissions = hidden @ W.T + b ; returns (T, B, NT), time-major."""
    T, B, H = hidden_tbh.shape
    NT = weight.shape[0]
    M = T * B
    h2d = hidden_tbh.reshape(M, H)      # free reshape of (T, B, H); no transpose
    w_t = jnp.transpose(weight)         # (H, NT)
    b2d = bias.reshape(1, NT)
    # Row tile: single block at small M; 512-row tiles when M tiles cleanly.
    tm = 512 if (M % 512 == 0) else M

    em2d = pl.pallas_call(
        _emission_kernel,
        out_shape=jax.ShapeDtypeStruct((M, NT), jnp.float32),
        grid_spec=pltpu.PrefetchScalarGridSpec(
            num_scalar_prefetch=0,
            grid=(M // tm,),
            in_specs=[
                pl.BlockSpec((tm, H), lambda i: (i, 0)),
                pl.BlockSpec((H, NT), lambda i: (0, 0)),
                pl.BlockSpec((1, NT), lambda i: (0, 0)),
            ],
            out_specs=pl.BlockSpec((tm, NT), lambda i: (i, 0)),
        ),
        compiler_params=pltpu.CompilerParams(
            dimension_semantics=("parallel",)),
    )(h2d, w_t, b2d)
    return em2d.reshape(T, B, NT)


# --------------------------------------------------------------------------- #
# Viterbi recurrence over G sequences per grid step.                           #
# --------------------------------------------------------------------------- #
def _viterbi_kernel(em_ref,      # VMEM (T, G, NT) f32   emissions, time-major
                    lens_ref,    # VMEM (G, 1)     int32 sequence lengths
                    trans_ref,   # VMEM (NT, NT)   f32   transition[curr, prev]
                    bp_ref,      # OUT  (T, G, NT) int32 backpointers
                    fv_ref):     # OUT  (G, NT)    f32   forward var frozen at len-1
    T, G, NT = em_ref.shape
    trans3 = trans_ref[...].reshape(1, NT, NT)                   # [1, curr, prev]
    lens = lens_ref[...]                                         # (G, 1)
    prev_iota = lax.broadcasted_iota(jnp.int32, (1, NT, NT), 2)  # prev index

    # Row t=0 is never read by the backtracker; one cheap store keeps the output
    # deterministic (the old full-table zero-init is removed).
    bp_ref[0] = jnp.zeros((G, NT), jnp.int32)

    def step(t, fv):                                    # fv: (G, NT) over prev tags
        scores = fv[:, None, :] + trans3                # (G, curr, prev)
        m = jnp.max(scores, axis=-1, keepdims=True)     # (G, curr, 1)
        hit = jnp.where(scores == m, prev_iota, NT)
        bp_ref[t] = jnp.min(hit, axis=-1)               # first-occurrence argmax
        new_fv = m[:, :, 0] + em_ref[t]                 # (G, NT) over curr tags
        # Freeze the forward variable once t >= lens[g] (variable-length batch).
        return jnp.where(t < lens, new_fv, fv)

    fv_ref[...] = lax.fori_loop(1, T, step, em_ref[0], unroll=True)


# --------------------------------------------------------------------------- #
# Plain-JAX glue: best-tag argmax + data-dependent path backtracking.          #
# --------------------------------------------------------------------------- #
def _backtrack(bp, best_last, lens):
    """Recover best paths from backpointers (scalar, data-dependent gathers)."""
    B, T, NT = bp.shape
    ts = jnp.arange(T - 1, -1, -1)

    def one(bp_b, last_id, L):
        def step(tag, t):
            tn = jnp.minimum(t + 1, T - 1)
            cand = bp_b[tn, tag]
            nxt = jnp.where(t >= L - 1, last_id, cand)
            return nxt, nxt
        _, path_rev = lax.scan(step, last_id, ts)
        return path_rev[::-1]

    return jax.vmap(one)(bp, best_last, lens)


def linear_crf_forward(hidden_tbh, lens, weight, bias, transition):
    """Mirrors LinearCRF.forward.

    hidden_tbh: (T, B, H) f32 ; lens: (B,) int ; weight: (NT, H) ; bias: (NT,)
    Returns (paths (B, T) int32 padded to T, best_scores (B,) f32);
    only paths[b, :lens[b]] is meaningful.
    """
    T, B, H = hidden_tbh.shape
    NT = transition.shape[0]
    lens_i32 = lens.astype(jnp.int32)

    emissions = _project_emissions(hidden_tbh, weight, bias)      # (T, B, NT)

    # Group G sequences per grid step: fills sublanes and amortizes per-step
    # pipeline overhead of the tiny NT=5 recurrence.
    G = B if B <= 8 else 8
    pad = (-B) % G
    if pad:
        emissions = jnp.pad(emissions, ((0, 0), (0, pad), (0, 0)))
        lens_pad = jnp.concatenate([lens_i32, jnp.ones((pad,), jnp.int32)])
    else:
        lens_pad = lens_i32
    Bp = B + pad

    bp_tbn, fv = pl.pallas_call(
        _viterbi_kernel,
        out_shape=(
            jax.ShapeDtypeStruct((T, Bp, NT), jnp.int32),
            jax.ShapeDtypeStruct((Bp, NT), jnp.float32),
        ),
        grid_spec=pltpu.PrefetchScalarGridSpec(
            num_scalar_prefetch=0,
            grid=(Bp // G,),
            in_specs=[
                pl.BlockSpec((T, G, NT), lambda i: (0, i, 0)),
                pl.BlockSpec((G, 1), lambda i: (i, 0)),
                pl.BlockSpec((NT, NT), lambda i: (0, 0)),
            ],
            out_specs=[
                pl.BlockSpec((T, G, NT), lambda i: (0, i, 0)),
                pl.BlockSpec((G, NT), lambda i: (i, 0)),
            ],
        ),
        compiler_params=pltpu.CompilerParams(
            dimension_semantics=("parallel",)),
    )(emissions, lens_pad.reshape(Bp, 1), transition)

    fv = fv[:B]
    # Small int32 transpose of the backpointer table only (T*B*NT, not T*B*H).
    bp = jnp.transpose(bp_tbn[:, :B, :], (1, 0, 2))               # (B, T, NT)

    best_scores = jnp.max(fv, axis=-1)
    best_last = jnp.argmax(fv, axis=-1).astype(jnp.int32)
    paths = _backtrack(bp, best_last, lens_i32)
    return paths, best_scores


if __name__ == "__main__":
    T, B, H, NT = 8, 2, 32, 5
    key = jax.random.PRNGKey(0)
    kh, kw, kb, kt = jax.random.split(key, 4)

    def xavier_normal(k, shape):
        fan_out, fan_in = shape
        std = (2.0 / (fan_in + fan_out)) ** 0.5
        return std * jax.random.normal(k, shape, jnp.float32)

    # Deterministic synthetic parameters (shapes from LinearCRF.__init__).
    weight = xavier_normal(kw, (NT, H))                            # hidden2emission.weight
    bias = 0.1 * jax.random.normal(kb, (NT,), jnp.float32)         # hidden2emission.bias
    transition = xavier_normal(kt, (NT, NT))                       # _transition

    hidden = jax.random.normal(kh, (T, B, H), jnp.float32)         # (len, batch, hidden)
    lens = jnp.array([8, 5], jnp.int32)
    # `masks` is not consumed by LinearCRF.forward, so it is omitted here.

    paths, scores = linear_crf_forward(hidden, lens, weight, bias, transition)
    paths = jax.block_until_ready(paths)
    scores = jax.block_until_ready(scores)

    # Pure-numpy reference mirroring LinearCRF._viterbi_decode.
    em = np.einsum("tbh,nh->tbn", np.asarray(hidden), np.asarray(weight)) + np.asarray(bias)
    trans_np = np.asarray(transition)

    def ref_viterbi(e):
        fv = e[0].copy()
        bps = []
        for t in range(1, e.shape[0]):
            s = fv[None, :] + trans_np
            bps.append(s.argmax(-1))
            fv = s.max(-1) + e[t]
        best_id = int(fv.argmax())
        best_score = float(fv.max())
        path = [best_id]
        for bpv in reversed(bps):
            path.append(int(bpv[path[-1]]))
        path.reverse()
        return path, best_score

    for bi in range(B):
        L = int(lens[bi])
        ref_path, ref_score = ref_viterbi(em[:L, bi])
        got_path = [int(x) for x in np.asarray(paths)[bi, :L]]
        got_score = float(np.asarray(scores)[bi])
        assert got_path == ref_path, (got_path, ref_path)
        assert abs(got_score - ref_score) < 1e-3, (got_score, ref_score)

    print("KERNEL_OK")
</pallas_src>

<mosaic_0001>
module attributes {stable_mosaic.version = 11 : i64} {
  func.func @_emission_kernel(%arg0: i32, %arg1: memref<16x32xf32, #tpu.memory_space<vmem>>, %arg2: memref<32x5xf32, #tpu.memory_space<vmem>>, %arg3: memref<1x5xf32, #tpu.memory_space<vmem>>, %arg4: memref<16x5xf32, #tpu.memory_space<vmem>>) attributes {dimension_semantics = [#tpu.dimension_semantics<parallel>], iteration_bounds = array<i64: 1>, scalar_prefetch = 0 : i64, scratch_operands = 0 : i64, tpu.core_type = #tpu.core_type<tc>, window_params = [{transform_indices = @transform_0, window_bounds = array<i64: 16, 32>}, {pipeline_mode = #tpu.pipeline_mode<synchronous>, transform_indices = @transform_1, window_bounds = array<i64: 32, 5>}, {pipeline_mode = #tpu.pipeline_mode<synchronous>, transform_indices = @transform_2, window_bounds = array<i64: 1, 5>}, {transform_indices = @transform_3, window_bounds = array<i64: 16, 5>}]} {
    %c0 = arith.constant 0 : index
    %c0_0 = arith.constant 0 : index
    %0 = vector.load %arg1[%c0, %c0_0] : memref<16x32xf32, #tpu.memory_space<vmem>>, vector<16x32xf32>
    %c0_1 = arith.constant 0 : index
    %c0_2 = arith.constant 0 : index
    %1 = vector.load %arg2[%c0_1, %c0_2] : memref<32x5xf32, #tpu.memory_space<vmem>>, vector<32x5xf32>
    %cst = arith.constant dense<0.000000e+00> : vector<16x5xf32>
    %2 = tpu.matmul %0, %1, %cst {dimension_numbers = #tpu.dot_dimension_numbers<[1], [0], [0], [1], [0, 0, 1, 1], [], []>} : vector<16x32xf32>, vector<32x5xf32>, vector<16x5xf32> -> vector<16x5xf32>
    %c0_3 = arith.constant 0 : index
    %c0_4 = arith.constant 0 : index
    %3 = vector.load %arg3[%c0_3, %c0_4] : memref<1x5xf32, #tpu.memory_space<vmem>>, vector<1x5xf32>
    %4 = vector.broadcast %3 : vector<1x5xf32> to vector<16x5xf32>
    %5 = arith.addf %2, %4 : vector<16x5xf32>
    %c0_5 = arith.constant 0 : index
    %c0_6 = arith.constant 0 : index
    %6 = vector.load %arg4[%c0_5, %c0_6] : memref<16x5xf32, #tpu.memory_space<vmem>>, vector<16x5xf32>
    tpu.vector_store %arg4[%c0_5, %c0_6], %5 {strides = array<i32>} : memref<16x5xf32, #tpu.memory_space<vmem>>, vector<16x5xf32>,
    return
  }
  func.func @transform_0(%arg0: i32) -> (i32, i32) {
    %c0_i32 = arith.constant 0 : i32
    %c0_i32_0 = arith.constant 0 : i32
    return %arg0, %c0_i32 : i32, i32
  }
  func.func @transform_1(%arg0: i32) -> (i32, i32) {
    %c0_i32 = arith.constant 0 : i32
    %c0_i32_0 = arith.constant 0 : i32
    %c0_i32_1 = arith.constant 0 : i32
    return %c0_i32, %c0_i32_0 : i32, i32
  }
  func.func @transform_2(%arg0: i32) -> (i32, i32) {
    %c0_i32 = arith.constant 0 : i32
    %c0_i32_0 = arith.constant 0 : i32
    %c0_i32_1 = arith.constant 0 : i32
    return %c0_i32, %c0_i32_0 : i32, i32
  }
  func.func @transform_3(%arg0: i32) -> (i32, i32) {
    %c0_i32 = arith.constant 0 : i32
    %c0_i32_0 = arith.constant 0 : i32
    return %arg0, %c0_i32 : i32, i32
  }
}

</mosaic_0001>

<bundles_post_ra>
// kernel: tpu_custom_call.1
= control target key start
LH: loop header
LB: loop body
LE: loop exit
PB: predicated region body
PF: predicated region fallthrough
CT: control target
= control target key end

     0   :  { %vm27_vm0 = vcmask 261120   ;;  %vm109_vm1 = vcmask 39936   ;;  %s191_s1 = inlined_call_operand.vmem [shape: f32[32,5], index: 1, kind: input, shape index: {}]   ;;  %s192_s0 = inlined_call_operand.vmem [shape: f32[16,32], index: 0, kind: input, shape index: {}]   ;;  %s193_s2 = inlined_call_operand.vmem [shape: f32[1,5], index: 2, kind: input, shape index: {}]   ;;  %s194_s3 = inlined_call_operand.vmem [shape: f32[16,5], index: 3, kind: output, shape index: {}]  }
   0x1   :  { %v16_v0 = vld [vmem:[%s191_s1] sm:$0xff]  ;;  %v17_v1 = vld [vmem:[%s191_s1 + $0x8] sm:$0xff]  ;;  %v18_v2 = vld [vmem:[%s191_s1 + $0x10] sm:$0xff] }
   0x2   :  { %v136_v3 = vpack.c.bf16 %v17_v1, %v16_v0  ;;  %v19_v4 = vld [vmem:[%s191_s1 + $0x18] sm:$0xff]  ;;  %v14_v5 = vld [vmem:[%s192_s0] sm:$0xff]  ;;  %v15_v7 = vld [vmem:[%s192_s0 + $0x8] sm:$0xff] }
   0x3   :  { %v140_v6 = vpack.c.bf16 %v19_v4, %v18_v2  ;;  %133 = vmatprep.mubr.msk.f32.mxu0 %vm27_vm0, %v14_v5  ;;  %v116_v8 = vld [vmem:[%s193_s2] ss:$0 sm:$0xff] }
   0x4   :  { %137 = vmatprep.subr.bf16.mxu0 %v136_v3 }
   0x5   :  { %139 = vmatpush3.bf16.msra.mxu0 %v136_v3 }
   0x6   :  { %141 = vmatprep.subr.bf16.mxu0 %v140_v6 }
   0x9   :  { %143 = vmatpush3.bf16.msra.mxu0 %v140_v6 }
   0xc   :  { %134 = vmatmul.mubr.msk.f32.vlgmr.msra.gmra.mrb[0].mxu0 %vm27_vm0, %v15_v7 }
  0xdf   :  { %v135_v9 = vpop.f32.mrb[0].mxu0 }
  0xe0   :  { %v106_v10 = vadd.f32 %v135_v9, %v116_v8  ;;  %v100_v11 = vpop.f32.mrb[1].mxu0 }
  0xe1   :  { %v101_v12 = vadd.f32 %v116_v8, %v100_v11 }
  0xe2   :  { %111 = vst.msk [vmem:[%s194_s3 + $0x8] sm:$0xff] %vm109_vm1, %v106_v10 }
  0xe3   :  { %110 = vst.msk [vmem:[%s194_s3] sm:$0xff] %vm109_vm1, %v101_v12 }

</bundles_post_ra>
